<compile_context>
chip_gen: v6e
topology: v6e:2x2x1
jax: 0.10.0
libtpu: 0.0.40
codegen_flags: <defaults>
</compile_context>

<pallas_src>
import jax
import jax.numpy as jnp
from jax.experimental import pallas as pl
from jax.experimental.pallas import tpu as pltpu


def _round_up(x, m):
    return ((x + m - 1) // m) * m


def _mlp_kernel(x_ref, w1_ref, b1_ref, w2_ref, b2_ref, o_ref):
    # x_ref : (TB, F)  activation tile (batch on sublanes, features on lanes)
    # w1_ref: (F, H)   first-layer weight  (VMEM-resident, constant index map)
    # b1_ref: (1, H)   first-layer bias (row vector, broadcast over sublanes)
    # w2_ref: (1, H)   second-layer weight (row vector)
    # b2_ref: (1, 1)   second-layer bias, SMEM scalar
    # o_ref : (TB, 1)  output column (tiny writeback: 4 B per batch row)

    # Layer 1 on the MXU in its native orientation: no relayout of x needed.
    h = jnp.dot(x_ref[...], w1_ref[...], preferred_element_type=jnp.float32)
    h = jnp.maximum(h + b1_ref[...], 0.0)                       # (TB, H), VPU

    # Layer 2 (64 -> 1): lane-broadcast multiply (VPU) + cross-lane reduce
    # (XLU) instead of an N=1 MXU matmul.
    out = jnp.sum(h * w2_ref[...], axis=1, keepdims=True)       # (TB, 1)
    o_ref[...] = (out + b2_ref[0, 0]).astype(o_ref.dtype)


def neural_network_forward(x, w1, b1, w2, b2, *,
                           block_b=8192, min_kernel_batch=2048):
    """Pallas equivalent of NeuralNetwork.forward: returns shape (B,).

    x : (B, F) float32
    w1: (F, H), b1: (H,), w2: (H, 1) (or (H,)), b2: scalar
    """
    B, F = x.shape
    H = w1.shape[1]

    xc = jnp.asarray(x, jnp.float32)
    w1c = jnp.asarray(w1, jnp.float32)
    b1c = jnp.asarray(b1, jnp.float32).reshape(1, H)
    w2c = jnp.asarray(w2, jnp.float32).reshape(1, H)
    b2c = jnp.asarray(b2, jnp.float32).reshape(1, 1)

    if B < max(min_kernel_batch, 8):
        # Kernel-launch + per-grid-step overhead dwarfs the work at small B:
        # let XLA's fused GEMM path handle it.
        h = jnp.maximum(xc @ w1c + b1c, 0.0)
        return h @ w2c[0] + b2c[0, 0]

    # ---- tile / grid selection (no padding / copying of x) -----------------
    # Grow tiles (amortize per-step overhead) but always keep an even number
    # of >= 2 batch blocks so v7x's two TensorCores both get work and the
    # x DMA overlaps compute.  tb only needs 8-sublane alignment here (the
    # batch is the sublane axis of both x and the output).
    tb_cap = max(8, min(block_b, 8192))
    nblocks = max(2, pl.cdiv(B, tb_cap))
    if nblocks % 2:
        nblocks += 1
    tb = _round_up(pl.cdiv(B, nblocks), 8)
    tb = max(8, min(tb, _round_up(B, 8)))
    grid = pl.cdiv(B, tb)

    cost = pl.CostEstimate(
        flops=2 * B * F * H + 4 * B * H,
        transcendentals=0,
        bytes_accessed=B * F * 4 + B * 4 + (F * H + 2 * H + 1) * 4,
    )

    compiler_params = pltpu.CompilerParams(
        dimension_semantics=("parallel",),   # batch tiles shard over TCs (v7x)
        # x and out VMEM buffers are each lane/sublane padded to tb*512 B and
        # double-buffered (~16 MiB total at tb=8192); raise the scoped-VMEM
        # limit past v5e's 16 MiB default, still well under physical VMEM on
        # v5e/v6e/v7x.
        vmem_limit_bytes=32 * 1024 * 1024,
    )

    out_col = pl.pallas_call(
        _mlp_kernel,
        out_shape=jax.ShapeDtypeStruct((B, 1), jnp.float32),
        grid_spec=pltpu.PrefetchScalarGridSpec(
            num_scalar_prefetch=0,
            grid=(grid,),
            in_specs=[
                pl.BlockSpec((tb, F), lambda i: (i, 0)),    # x: tiled over batch
                pl.BlockSpec((F, H), lambda i: (0, 0)),     # w1: fetched once
                pl.BlockSpec((1, H), lambda i: (0, 0)),     # b1: fetched once
                pl.BlockSpec((1, H), lambda i: (0, 0)),     # w2: fetched once
                pl.BlockSpec(memory_space=pltpu.MemorySpace.SMEM),  # b2 scalar
            ],
            out_specs=pl.BlockSpec((tb, 1), lambda i: (i, 0)),
        ),
        compiler_params=compiler_params,
        cost_estimate=cost,
    )(xc, w1c, b1c, w2c, b2c)

    # (B, 1) -> (B,): contiguous, free (no strided gather).
    return out_col.reshape(B)


def init_params(features_num, hidden=64, key=jax.random.PRNGKey(42)):
    """Deterministic PyTorch-Linear-like uniform fan-in init."""
    k1, k2, k3, k4 = jax.random.split(key, 4)
    bound1 = 1.0 / jnp.sqrt(features_num)
    bound2 = 1.0 / jnp.sqrt(hidden)
    w1 = jax.random.uniform(k1, (features_num, hidden), jnp.float32, -bound1, bound1)
    b1 = jax.random.uniform(k2, (hidden,), jnp.float32, -bound1, bound1)
    w2 = jax.random.uniform(k3, (hidden, 1), jnp.float32, -bound2, bound2)
    b2 = jax.random.uniform(k4, (), jnp.float32, -bound2, bound2)
    return w1, b1, w2, b2


# TODO(synk): cal_loss (RMSE + L1 regularization) is a training-time utility,
# not part of forward(); it is intentionally not implemented as a kernel.

if __name__ == "__main__":
    features_num = 32
    hidden = 64

    key = jax.random.PRNGKey(0)
    kx, kp = jax.random.split(key)
    w1, b1, w2, b2 = init_params(features_num, hidden, kp)

    def reference(x):
        return (jnp.maximum(x @ w1 + b1, 0.0) @ w2 + b2)[:, 0]

    # batch=500: non-tile-aligned -> exercises the partial last block (no pad).
    # batch=1024: exact division.  min_kernel_batch=0 forces the Pallas path
    # (the default of 2048 would route such tiny batches to the XLA fallback).
    for batch in (500, 1024):
        x = jax.random.normal(jax.random.fold_in(kx, batch),
                              (batch, features_num), dtype=jnp.float32)
        y = neural_network_forward(x, w1, b1, w2, b2, min_kernel_batch=0)
        y = jax.block_until_ready(y)
        ref = reference(x)
        assert y.shape == (batch,)
        assert jnp.allclose(y, ref, atol=1e-4, rtol=1e-4), (
            "max abs err", float(jnp.max(jnp.abs(y - ref))))

    print("KERNEL_OK")
</pallas_src>

<mosaic_0001>
module attributes {stable_mosaic.version = 11 : i64} {
  func.func @_mlp_kernel(%arg0: i32, %arg1: memref<256x32xf32, #tpu.memory_space<vmem>>, %arg2: memref<32x64xf32, #tpu.memory_space<vmem>>, %arg3: memref<1x64xf32, #tpu.memory_space<vmem>>, %arg4: memref<1x64xf32, #tpu.memory_space<vmem>>, %arg5: memref<1x1xf32, #tpu.memory_space<smem>>, %arg6: memref<256x1xf32, #tpu.memory_space<vmem>>) attributes {dimension_semantics = [#tpu.dimension_semantics<parallel>], iteration_bounds = array<i64: 2>, scalar_prefetch = 0 : i64, scratch_operands = 0 : i64, tpu.core_type = #tpu.core_type<tc>, window_params = [{transform_indices = @transform_0, window_bounds = array<i64: 256, 32>}, {pipeline_mode = #tpu.pipeline_mode<synchronous>, transform_indices = @transform_1, window_bounds = array<i64: 32, 64>}, {pipeline_mode = #tpu.pipeline_mode<synchronous>, transform_indices = @transform_2, window_bounds = array<i64: 1, 64>}, {pipeline_mode = #tpu.pipeline_mode<synchronous>, transform_indices = @transform_3, window_bounds = array<i64: 1, 64>}, {transform_indices = @transform_4, window_bounds = array<i64: 1, 1>}, {transform_indices = @transform_5, window_bounds = array<i64: 256, 1>}]} {
    %c0 = arith.constant 0 : index
    %c0_0 = arith.constant 0 : index
    %0 = vector.load %arg1[%c0, %c0_0] : memref<256x32xf32, #tpu.memory_space<vmem>>, vector<256x32xf32>
    %c0_1 = arith.constant 0 : index
    %c0_2 = arith.constant 0 : index
    %1 = vector.load %arg2[%c0_1, %c0_2] : memref<32x64xf32, #tpu.memory_space<vmem>>, vector<32x64xf32>
    %cst = arith.constant dense<0.000000e+00> : vector<256x64xf32>
    %2 = tpu.matmul %0, %1, %cst {dimension_numbers = #tpu.dot_dimension_numbers<[1], [0], [0], [1], [0, 0, 1, 1], [], []>} : vector<256x32xf32>, vector<32x64xf32>, vector<256x64xf32> -> vector<256x64xf32>
    %c0_3 = arith.constant 0 : index
    %c0_4 = arith.constant 0 : index
    %3 = vector.load %arg3[%c0_3, %c0_4] : memref<1x64xf32, #tpu.memory_space<vmem>>, vector<1x64xf32>
    %4 = vector.broadcast %3 : vector<1x64xf32> to vector<256x64xf32>
    %5 = arith.addf %2, %4 : vector<256x64xf32>
    %cst_5 = arith.constant 0.000000e+00 : f32
    %6 = vector.broadcast %cst_5 : f32 to vector<256x64xf32>
    %7 = arith.maximumf %5, %6 : vector<256x64xf32>
    %c0_6 = arith.constant 0 : index
    %c0_7 = arith.constant 0 : index
    %8 = vector.load %arg4[%c0_6, %c0_7] : memref<1x64xf32, #tpu.memory_space<vmem>>, vector<1x64xf32>
    %9 = vector.broadcast %8 : vector<1x64xf32> to vector<256x64xf32>
    %10 = arith.mulf %7, %9 : vector<256x64xf32>
    %cst_8 = arith.constant dense<0.000000e+00> : vector<256xf32>
    %11 = vector.multi_reduction <add>, %10, %cst_8 [1] : vector<256x64xf32> to vector<256xf32>
    %12 = vector.shape_cast %11 : vector<256xf32> to vector<256x1xf32>
    %c0_9 = arith.constant 0 : index
    %c0_10 = arith.constant 0 : index
    %13 = memref.load %arg5[%c0_9, %c0_10] : memref<1x1xf32, #tpu.memory_space<smem>>
    %14 = vector.broadcast %13 : f32 to vector<256x1xf32>
    %15 = arith.addf %12, %14 : vector<256x1xf32>
    %c0_11 = arith.constant 0 : index
    %c0_12 = arith.constant 0 : index
    %16 = vector.load %arg6[%c0_11, %c0_12] : memref<256x1xf32, #tpu.memory_space<vmem>>, vector<256x1xf32>
    tpu.vector_store %arg6[%c0_11, %c0_12], %15 {strides = array<i32>} : memref<256x1xf32, #tpu.memory_space<vmem>>, vector<256x1xf32>,
    return
  }
  func.func @transform_0(%arg0: i32) -> (i32, i32) {
    %c0_i32 = arith.constant 0 : i32
    %c0_i32_0 = arith.constant 0 : i32
    return %arg0, %c0_i32 : i32, i32
  }
  func.func @transform_1(%arg0: i32) -> (i32, i32) {
    %c0_i32 = arith.constant 0 : i32
    %c0_i32_0 = arith.constant 0 : i32
    %c0_i32_1 = arith.constant 0 : i32
    return %c0_i32, %c0_i32_0 : i32, i32
  }
  func.func @transform_2(%arg0: i32) -> (i32, i32) {
    %c0_i32 = arith.constant 0 : i32
    %c0_i32_0 = arith.constant 0 : i32
    %c0_i32_1 = arith.constant 0 : i32
    return %c0_i32, %c0_i32_0 : i32, i32
  }
  func.func @transform_3(%arg0: i32) -> (i32, i32) {
    %c0_i32 = arith.constant 0 : i32
    %c0_i32_0 = arith.constant 0 : i32
    %c0_i32_1 = arith.constant 0 : i32
    return %c0_i32, %c0_i32_0 : i32, i32
  }
  func.func @transform_4(%arg0: i32) -> (i32, i32) {
    %c0_i32 = arith.constant 0 : i32
    %c0_i32_0 = arith.constant 0 : i32
    %c0_i32_1 = arith.constant 0 : i32
    return %c0_i32, %c0_i32_0 : i32, i32
  }
  func.func @transform_5(%arg0: i32) -> (i32, i32) {
    %c0_i32 = arith.constant 0 : i32
    %c0_i32_0 = arith.constant 0 : i32
    return %arg0, %c0_i32 : i32, i32
  }
}

</mosaic_0001>

<bundles_post_ra>
// kernel: tpu_custom_call.1
= control target key start
LH: loop header
LB: loop body
LE: loop exit
PB: predicated region body
PF: predicated region fallthrough
CT: control target
= control target key end

     0   :  { %s2018_s0 = inlined_call_operand.vmem [shape: f32[500,32], index: 0, kind: input, shape index: {}]   ;;  %s2019_s1 = inlined_call_operand.vmem [shape: f32[32,64], index: 1, kind: input, shape index: {}]   ;;  %s2020_s2 = inlined_call_operand.vmem [shape: f32[1,64], index: 2, kind: input, shape index: {}]   ;;  %s2021_s3 = inlined_call_operand.vmem [shape: f32[1,64], index: 3, kind: input, shape index: {}]   ;;  %s2022_s4 = inlined_call_operand.<no memory space> [shape: f32[1,1], index: 4, kind: input, shape index: {}]   ;;  %s2023_s5 = inlined_call_operand.vmem [shape: f32[500,1], index: 5, kind: output, shape index: {}]  }
   0x1   :  { %10 = sst [smem:[#allocation2]] %s2022_s4 }
   0x2   :  { %s1557_s20 = smov 0   ;;  %s1559_s21 = smov 0  }
   0x3   :  { %s1561_s22 = smov 0  }
   0x4 LB: > { %s1570_s4 = sadd.s32 4294967295, %s1490_s22   ;;  %s1572_s23 = sadd.s32 1, %s1490_s22   ;;  %s1490_s22 = sphi %s1561_s22, %s2032_s22   ;;  %s1486_s21 = sphi %s1559_s21, %s2031_s21   ;;  %s1482_s20 = sphi %s1557_s20, %s2030_s20  }
   0x5   : > { %s130_s24 = ssub.s32 %s1490_s22, %s1572_s23  ;;  %s133_s25 = sadd.s32 1, %s1486_s21 }
   0x6   : > { %p131_p0 = scmp.eq.s32.totalorder %s130_s24, 0  ;;  %p143_p1 = scmp.ne.s32.totalorder %s1486_s21, %s1482_s20 }
   0x7   : > { %p144_p2 = scmp.eq.s32.totalorder %s1570_s4, 1  ;;  %p1190_p3 = scmp.ge.s32.totalorder %s1490_s22, 1 }
   0x8   : > { %s1580_s26 = scalar_select %p131_p0, %s1486_s21, %s133_s25  }
   0x9   : > { %p1582_p4 = por %p144_p2, %p143_p1  ;;  %p197_p5 = scmp.lt.s32.totalorder %s1490_s22, 3 }
   0xb   : > { %p198_p6 = pnand %p1190_p3, %p197_p5 }
   0xc   : > { %s1593_s7 = sshll.u32 (!%p198_p6), %s1570_s4, 5  ;;  %s780_s24 = sld [smem:[#allocation2]] (!%p198_p6) }
   0xd   : > { %201 = sbr.rel (%p198_p6) target bundleno = 478 (0x1de), region = 40  ;;  %p233_p7 = scmp.lt.s32.totalorder (!%p198_p6), %s1593_s7, 62 }
   0xe   : > { %s225_s25 = sand.u32 (!%p198_p6), 1, %s1482_s20  }
   0xf   : > { %s1191_s28 = sshll.u32 (!%p198_p6), %s225_s25, 8 }
  0x10   : > { %s1783_s29 = scalar_lea.vmem (!%p198_p6), [#allocation3], %s1191_s28  }
  0x12   : > { %v282_v0 = vld [vmem:[%s2019_s1 + $0x18] sm:$0xff]  ;;  %v281_v1 = vld [vmem:[%s2019_s1 + $0x10] sm:$0xff]  ;;  %v280_v2 = vld [vmem:[%s2019_s1 + $0x8] sm:$0xff]  ;;  %s234_s10 = scalar_select %p233_p7, %s1593_s7, 62  ;;  %vm290_vm0 = vcmask 261120   ;;  %vm683_vm1 = vcmask 523264  }
  0x13   : > { %1284 = vmatprep.subr.mxu0 %v282_v0  ;;  %1340 = vmatprep.subr.mxu1 %v282_v0  ;;  %v279_v3 = vld [vmem:[%s2019_s1] sm:$0xff]  ;;  %vm814_vm2 = vcmask 7168   ;;  %s855_s20 = ssub.s32 (%p1582_p4), 63, %s1593_s7  ;;  %s1245_s30 = sshll.u32 (%p1582_p4), %s1570_s4, 8 }
  0x14   : > { %1285 = vmatpush3.msra.mxu0 %v282_v0  ;;  %1344 = vmatpush3.msra.mxu1 %v282_v0  ;;  %s1193_s13 = sshll.u32 %s234_s10, 3  ;;  %v1675_v36 = vld [vmem:[%s2020_s2] ss:$0 sm:$0xff]  ;;  %p856_p8 = scmp.lt.s32.totalorder (%p1582_p4), %s855_s20, 32 }
  0x15   : > { %1286 = vmatprep.subr.mxu0 %v281_v1  ;;  %1341 = vmatprep.subr.mxu1 %v281_v1  ;;  %s1606_s16 = scalar_lea.vmem %s2018_s0, %s1193_s13  ;;  %v1684_v47 = vld [vmem:[%s2021_s3] ss:$0 sm:$0xff]  ;;  %s1886_s9 = scalar_lea.vmem (%p1582_p4), %s2023_s5, %s1245_s30  }
  0x16   : > { %1287 = vmatpush3.msra.mxu0 %v281_v1  ;;  %1345 = vmatpush3.msra.mxu1 %v281_v1  ;;  %v247_v4 = vld [vmem:[%s1606_s16] sm:$0xff]  ;;  %v248_v6 = vld [vmem:[%s1606_s16 + $0x8] sm:$0xff]  ;;  %v249_v8 = vld [vmem:[%s1606_s16 + $0x10] sm:$0xff] }
  0x17   : > { %1288 = vmatprep.subr.mxu0 %v280_v2  ;;  %1342 = vmatprep.subr.mxu1 %v280_v2  ;;  %v263_v5 = vld [vmem:[%s1606_s16 + $0x80] sm:$0xff]  ;;  %v264_v7 = vld [vmem:[%s1606_s16 + $0x88] sm:$0xff]  ;;  %v265_v9 = vld [vmem:[%s1606_s16 + $0x90] sm:$0xff] }
  0x18   : > { %1289 = vmatpush3.msra.mxu0 %v280_v2  ;;  %1346 = vmatpush3.msra.mxu1 %v280_v2  ;;  %v250_v10 = vld [vmem:[%s1606_s16 + $0x18] sm:$0xff]  ;;  %v251_v12 = vld [vmem:[%s1606_s16 + $0x20] sm:$0xff]  ;;  %v252_v14 = vld [vmem:[%s1606_s16 + $0x28] sm:$0xff] }
  0x19   : > { %1290 = vmatprep.subr.mxu0 %v279_v3  ;;  %1343 = vmatprep.subr.mxu1 %v279_v3  ;;  %v266_v11 = vld [vmem:[%s1606_s16 + $0x98] sm:$0xff]  ;;  %v267_v13 = vld [vmem:[%s1606_s16 + $0xa0] sm:$0xff]  ;;  %v268_v15 = vld [vmem:[%s1606_s16 + $0xa8] sm:$0xff] }
  0x1a   : > { %1291 = vmatpush3.msra.mxu0 %v279_v3  ;;  %1347 = vmatpush3.msra.mxu1 %v279_v3  ;;  %v253_v16 = vld [vmem:[%s1606_s16 + $0x30] sm:$0xff]  ;;  %v254_v18 = vld [vmem:[%s1606_s16 + $0x38] sm:$0xff]  ;;  %v255_v20 = vld [vmem:[%s1606_s16 + $0x40] sm:$0xff] }
  0x1b   : > { %1292 = vmatprep.mubr.msk.f32.mxu0 %vm290_vm0, %v247_v4  ;;  %1316 = vmatprep.mubr.msk.f32.mxu1 %vm290_vm0, %v263_v5  ;;  %v269_v17 = vld [vmem:[%s1606_s16 + $0xb0] sm:$0xff]  ;;  %v270_v19 = vld [vmem:[%s1606_s16 + $0xb8] sm:$0xff]  ;;  %v271_v21 = vld [vmem:[%s1606_s16 + $0xc0] sm:$0xff] }
  0x1c   : > { %1293 = vmatmul.mubr.msk.f32.vlgmr.msra.gmra.mxu0 %vm290_vm0, %v248_v6  ;;  %1317 = vmatmul.mubr.msk.f32.vlgmr.msra.gmra.mxu1 %vm290_vm0, %v264_v7  ;;  %v256_v22 = vld [vmem:[%s1606_s16 + $0x48] sm:$0xff]  ;;  %v257_v24 = vld [vmem:[%s1606_s16 + $0x50] sm:$0xff]  ;;  %v258_v26 = vld [vmem:[%s1606_s16 + $0x58] sm:$0xff] }
  0x1d   : > { %1295 = vmatprep.mubr.msk.f32.mxu0 %vm290_vm0, %v249_v8  ;;  %1319 = vmatprep.mubr.msk.f32.mxu1 %vm290_vm0, %v265_v9  ;;  %v272_v23 = vld [vmem:[%s1606_s16 + $0xc8] sm:$0xff]  ;;  %v273_v25 = vld [vmem:[%s1606_s16 + $0xd0] sm:$0xff]  ;;  %v274_v27 = vld [vmem:[%s1606_s16 + $0xd8] sm:$0xff] }
  0x1e   : > { %v259_v28 = vld [vmem:[%s1606_s16 + $0x60] sm:$0xff]  ;;  %v260_v30 = vld [vmem:[%s1606_s16 + $0x68] sm:$0xff]  ;;  %v261_v32 = vld [vmem:[%s1606_s16 + $0x70] sm:$0xff] }
  0x1f   : > { %v275_v29 = vld [vmem:[%s1606_s16 + $0xe0] sm:$0xff]  ;;  %v276_v31 = vld [vmem:[%s1606_s16 + $0xe8] sm:$0xff]  ;;  %v277_v33 = vld [vmem:[%s1606_s16 + $0xf0] sm:$0xff] }
  0x20   : > { %1296 = vmatmul.mubr.msk.f32.gmra.mxu0 %vm290_vm0, %v250_v10  ;;  %1320 = vmatmul.mubr.msk.f32.gmra.mxu1 %vm290_vm0, %v266_v11  ;;  %v262_v34 = vld [vmem:[%s1606_s16 + $0x78] sm:$0xff] }
  0x21   : > { %1298 = vmatprep.mubr.msk.f32.mxu0 %vm290_vm0, %v251_v12  ;;  %1322 = vmatprep.mubr.msk.f32.mxu1 %vm290_vm0, %v267_v13  ;;  %v278_v35 = vld [vmem:[%s1606_s16 + $0xf8] sm:$0xff] }
  0x24   : > { %1299 = vmatmul.mubr.msk.f32.gmra.mxu0 %vm290_vm0, %v252_v14  ;;  %1323 = vmatmul.mubr.msk.f32.gmra.mxu1 %vm290_vm0, %v268_v15 }
  0x25   : > { %1301 = vmatprep.mubr.msk.f32.mxu0 %vm290_vm0, %v253_v16  ;;  %1325 = vmatprep.mubr.msk.f32.mxu1 %vm290_vm0, %v269_v17 }
  0x28   : > { %1302 = vmatmul.mubr.msk.f32.gmra.mxu0 %vm290_vm0, %v254_v18  ;;  %1326 = vmatmul.mubr.msk.f32.gmra.mxu1 %vm290_vm0, %v270_v19 }
  0x29   : > { %1304 = vmatprep.mubr.msk.f32.mxu0 %vm290_vm0, %v255_v20  ;;  %1328 = vmatprep.mubr.msk.f32.mxu1 %vm290_vm0, %v271_v21 }
  0x2c   : > { %1305 = vmatmul.mubr.msk.f32.gmra.mxu0 %vm290_vm0, %v256_v22  ;;  %1329 = vmatmul.mubr.msk.f32.gmra.mxu1 %vm290_vm0, %v272_v23 }
  0x2d   : > { %1307 = vmatprep.mubr.msk.f32.mxu0 %vm290_vm0, %v257_v24  ;;  %1331 = vmatprep.mubr.msk.f32.mxu1 %vm290_vm0, %v273_v25 }
  0x30   : > { %1308 = vmatmul.mubr.msk.f32.gmra.mxu0 %vm290_vm0, %v258_v26  ;;  %1332 = vmatmul.mubr.msk.f32.gmra.mxu1 %vm290_vm0, %v274_v27 }
  0x31   : > { %1310 = vmatprep.mubr.msk.f32.mxu0 %vm290_vm0, %v259_v28  ;;  %1334 = vmatprep.mubr.msk.f32.mxu1 %vm290_vm0, %v275_v29 }
  0x34   : > { %1311 = vmatmul.mubr.msk.f32.gmra.mxu0 %vm290_vm0, %v260_v30  ;;  %1335 = vmatmul.mubr.msk.f32.gmra.mxu1 %vm290_vm0, %v276_v31 }
  0x35   : > { %1313 = vmatprep.mubr.msk.f32.mxu0 %vm290_vm0, %v261_v32  ;;  %1337 = vmatprep.mubr.msk.f32.mxu1 %vm290_vm0, %v277_v33 }
  0x38   : > { %1314 = vmatmul.mubr.msk.f32.gmra.mxu0 %vm290_vm0, %v262_v34  ;;  %1338 = vmatmul.mubr.msk.f32.gmra.mxu1 %vm290_vm0, %v278_v35 }
  0xdc   : > { %v1294_v37 = vpop.f32.mrf.mxu0  ;;  %v1318_v38 = vpop.f32.mrf.mxu1 }
  0xdd   : > { %v459_v39 = vadd.f32 %v1294_v37, %v1675_v36  ;;  %v539_v40 = vadd.f32 %v1318_v38, %v1675_v36 }
  0xde   : > { %v453_v41 = vpop.f32.mrf.mxu0  ;;  %v533_v42 = vpop.f32.mrf.mxu1 }
  0xdf   : > { %v613_v43 = vmax.f32 %v459_v39, 0.0  ;;  %v629_v44 = vmax.f32 %v539_v40, 0.0  ;;  %v454_v45 = vadd.f32 %v1675_v36, %v453_v41  ;;  %v534_v46 = vadd.f32 %v1675_v36, %v533_v42 }
  0xe0   : > { %v1297_v48 = vpop.f32.mrf.mxu0  ;;  %v1321_v49 = vpop.f32.mrf.mxu1 }
  0xe1   : > { %v612_v50 = vmax.f32 %v454_v45, 0.0  ;;  %v469_v51 = vadd.f32 %v1297_v48, %v1675_v36  ;;  %v549_v52 = vadd.f32 %v1321_v49, %v1675_v36  ;;  %v668_v54 = vmul.f32 %v1684_v47, %v629_v44 }
  0xe2   : > { %v463_v53 = vpop.f32.mrf.mxu0  ;;  %v543_v55 = vpop.f32.mrf.mxu1  ;;  %v652_v56 = vmul.f32 %v1684_v47, %v613_v43  ;;  %v628_v57 = vmax.f32 %v534_v46, 0.0 }
  0xe3   : > { %v615_v58 = vmax.f32 %v469_v51, 0.0  ;;  %v464_v59 = vadd.f32 %v1675_v36, %v463_v53  ;;  %v631_v60 = vmax.f32 %v549_v52, 0.0  ;;  %v735_v61 = vsel %vm683_vm1, %v668_v54, 0.0 }
  0xe4   : > { %v544_v62 = vadd.f32 %v1675_v36, %v543_v55  ;;  %v687_v63 = vsel %vm683_vm1, %v652_v56, 0.0  ;;  %v1300_v0 = vpop.f32.mrf.mxu0  ;;  %v651_v1 = vmul.f32 %v1684_v47, %v612_v50  ;;  %v1324_v2 = vpop.f32.mrf.mxu1  ;;  %736 = vadd.xlane.f32.xlu1 %v735_v61  ;;  %v667_v8 = vmul.f32 %v1684_v47, %v628_v57 }
  0xe5   : > { %688 = vadd.xlane.f32.xlu0 %v687_v63  ;;  %v654_v3 = vmul.f32 %v1684_v47, %v615_v58  ;;  %v670_v5 = vmul.f32 %v1684_v47, %v631_v60  ;;  %v479_v7 = vadd.f32 %v1300_v0, %v1675_v36  ;;  %v614_v9 = vmax.f32 %v464_v59, 0.0 }
  0xe6   : > { %v473_v4 = vpop.f32.mrf.mxu0  ;;  %v630_v10 = vmax.f32 %v544_v62, 0.0  ;;  %v684_v11 = vsel %vm683_vm1, %v651_v1, 0.0  ;;  %v553_v13 = vpop.f32.mrf.mxu1  ;;  %v559_v17 = vadd.f32 %v1324_v2, %v1675_v36  ;;  %v732_v20 = vsel %vm683_vm1, %v667_v8, 0.0 }
  0xe7   : > { %v693_v6 = vsel %vm683_vm1, %v654_v3, 0.0  ;;  %v474_v12 = vadd.f32 %v1675_v36, %v473_v4  ;;  %v741_v15 = vsel %vm683_vm1, %v670_v5, 0.0  ;;  %v617_v16 = vmax.f32 %v479_v7, 0.0 }
  0xe8   : > { %694 = vadd.xlane.f32.xlu1 %v693_v6  ;;  %v1303_v14 = vpop.f32.mrf.mxu0  ;;  %v554_v18 = vadd.f32 %v1675_v36, %v553_v13  ;;  %v653_v21 = vmul.f32 %v1684_v47, %v614_v9  ;;  %v669_v22 = vmul.f32 %v1684_v47, %v630_v10  ;;  %v1327_v24 = vpop.f32.mrf.mxu1  ;;  %v633_v25 = vmax.f32 %v559_v17, 0.0 }
  0xe9   : > { %685 = vadd.xlane.f32.xlu0 %v684_v11  ;;  %v616_v19 = vmax.f32 %v474_v12, 0.0  ;;  %v489_v27 = vadd.f32 %v1303_v14, %v1675_v36  ;;  %v656_v28 = vmul.f32 %v1684_v47, %v617_v16  ;;  %v569_v37 = vadd.f32 %v1327_v24, %v1675_v36 }
  0xea   : > { %v483_v23 = vpop.f32.mrf.mxu0  ;;  %v632_v26 = vmax.f32 %v554_v18, 0.0  ;;  %v690_v29 = vsel %vm683_vm1, %v653_v21, 0.0  ;;  %v738_v30 = vsel %vm683_vm1, %v669_v22, 0.0  ;;  %v563_v33 = vpop.f32.mrf.mxu1  ;;  %v672_v39 = vmul.f32 %v1684_v47, %v633_v25 }
  0xeb   : > { %v484_v31 = vadd.f32 %v1675_v36, %v483_v23  ;;  %v655_v32 = vmul.f32 %v1684_v47, %v616_v19  ;;  %v619_v35 = vmax.f32 %v489_v27, 0.0  ;;  %v699_v38 = vsel %vm683_vm1, %v656_v28, 0.0 }
  0xec   : > { %742 = vadd.xlane.f32.xlu1 %v741_v15  ;;  %v1306_v34 = vpop.f32.mrf.mxu0  ;;  %v564_v42 = vadd.f32 %v1675_v36, %v563_v33  ;;  %v671_v43 = vmul.f32 %v1684_v47, %v632_v26  ;;  %v1330_v45 = vpop.f32.mrf.mxu1  ;;  %v635_v46 = vmax.f32 %v569_v37, 0.0  ;;  %v747_v49 = vsel %vm683_vm1, %v672_v39, 0.0 }
  0xed   : > { %733 = vadd.xlane.f32.xlu0 %v732_v20  ;;  %v618_v40 = vmax.f32 %v484_v31, 0.0  ;;  %v696_v41 = vsel %vm683_vm1, %v655_v32, 0.0  ;;  %v499_v48 = vadd.f32 %v1306_v34, %v1675_v36  ;;  %v658_v50 = vmul.f32 %v1684_v47, %v619_v35 }
  0xee   : > { %v493_v44 = vpop.f32.mrf.mxu0  ;;  %v634_v51 = vmax.f32 %v564_v42, 0.0  ;;  %v744_v52 = vsel %vm683_vm1, %v671_v43, 0.0  ;;  %v573_v55 = vpop.f32.mrf.mxu1  ;;  %v579_v58 = vadd.f32 %v1330_v45, %v1675_v36  ;;  %v674_v60 = vmul.f32 %v1684_v47, %v635_v46 }
  0xef   : > { %v494_v53 = vadd.f32 %v1675_v36, %v493_v44  ;;  %v657_v54 = vmul.f32 %v1684_v47, %v618_v40  ;;  %v621_v57 = vmax.f32 %v499_v48, 0.0  ;;  %v705_v59 = vsel %vm683_vm1, %v658_v50, 0.0 }
  0xf0   : > { %691 = vadd.xlane.f32.xlu1 %v690_v29  ;;  %v1309_v56 = vpop.f32.mrf.mxu0  ;;  %v574_v63 = vadd.f32 %v1675_v36, %v573_v55  ;;  %v673_v0 = vmul.f32 %v1684_v47, %v634_v51  ;;  %v1333_v2 = vpop.f32.mrf.mxu1  ;;  %v637_v3 = vmax.f32 %v579_v58, 0.0  ;;  %v753_v5 = vsel %vm683_vm1, %v674_v60, 0.0 }
  0xf1   : > { %739 = vadd.xlane.f32.xlu0 %v738_v30  ;;  %v620_v61 = vmax.f32 %v494_v53, 0.0  ;;  %v702_v62 = vsel %vm683_vm1, %v657_v54, 0.0  ;;  %v509_v4 = vadd.f32 %v1309_v56, %v1675_v36  ;;  %v660_v6 = vmul.f32 %v1684_v47, %v621_v57 }
  0xf2   : > { %v503_v1 = vpop.f32.mrf.mxu0  ;;  %v636_v7 = vmax.f32 %v574_v63, 0.0  ;;  %v750_v8 = vsel %vm683_vm1, %v673_v0, 0.0  ;;  %v583_v11 = vpop.f32.mrf.mxu1  ;;  %v589_v14 = vadd.f32 %v1333_v2, %v1675_v36  ;;  %v676_v16 = vmul.f32 %v1684_v47, %v637_v3 }
  0xf3   : > { %v504_v9 = vadd.f32 %v1675_v36, %v503_v1  ;;  %v659_v10 = vmul.f32 %v1684_v47, %v620_v61  ;;  %v623_v13 = vmax.f32 %v509_v4, 0.0  ;;  %v711_v15 = vsel %vm683_vm1, %v660_v6, 0.0 }
  0xf4   : > { %700 = vadd.xlane.f32.xlu1 %v699_v38  ;;  %v1312_v12 = vpop.f32.mrf.mxu0  ;;  %v584_v19 = vadd.f32 %v1675_v36, %v583_v11  ;;  %v675_v20 = vmul.f32 %v1684_v47, %v636_v7  ;;  %v1336_v22 = vpop.f32.mrf.mxu1  ;;  %v639_v23 = vmax.f32 %v589_v14, 0.0  ;;  %v759_v25 = vsel %vm683_vm1, %v676_v16, 0.0 }
  0xf5   : > { %697 = vadd.xlane.f32.xlu0 %v696_v41  ;;  %v622_v17 = vmax.f32 %v504_v9, 0.0  ;;  %v708_v18 = vsel %vm683_vm1, %v659_v10, 0.0  ;;  %v519_v24 = vadd.f32 %v1312_v12, %v1675_v36  ;;  %v662_v26 = vmul.f32 %v1684_v47, %v623_v13 }
  0xf6   : > { %v513_v21 = vpop.f32.mrf.mxu0  ;;  %v638_v27 = vmax.f32 %v584_v19, 0.0  ;;  %v756_v28 = vsel %vm683_vm1, %v675_v20, 0.0  ;;  %v593_v31 = vpop.f32.mrf.mxu1  ;;  %v599_v34 = vadd.f32 %v1336_v22, %v1675_v36  ;;  %v678_v37 = vmul.f32 %v1684_v47, %v639_v23 }
  0xf7   : > { %v514_v29 = vadd.f32 %v1675_v36, %v513_v21  ;;  %v661_v30 = vmul.f32 %v1684_v47, %v622_v17  ;;  %v625_v33 = vmax.f32 %v519_v24, 0.0  ;;  %v717_v35 = vsel %vm683_vm1, %v662_v26, 0.0 }
  0xf8   : > { %748 = vadd.xlane.f32.xlu1 %v747_v49  ;;  %v1315_v32 = vpop.f32.mrf.mxu0  ;;  %v594_v40 = vadd.f32 %v1675_v36, %v593_v31  ;;  %v677_v41 = vmul.f32 %v1684_v47, %v638_v27  ;;  %v1339_v43 = vpop.f32.mrf.mxu1  ;;  %v641_v44 = vmax.f32 %v599_v34, 0.0  ;;  %v765_v46 = vsel %vm683_vm1, %v678_v37, 0.0 }
  0xf9   : > { %745 = vadd.xlane.f32.xlu0 %v744_v52  ;;  %v624_v38 = vmax.f32 %v514_v29, 0.0  ;;  %v714_v39 = vsel %vm683_vm1, %v661_v30, 0.0  ;;  %v529_v45 = vadd.f32 %v1315_v32, %v1675_v36  ;;  %v664_v48 = vmul.f32 %v1684_v47, %v625_v33 }
  0xfa   : > { %v523_v42 = vpop.f32.mrf.mxu0  ;;  %v640_v49 = vmax.f32 %v594_v40, 0.0  ;;  %v762_v50 = vsel %vm683_vm1, %v677_v41, 0.0  ;;  %v603_v53 = vpop.f32.mrf.mxu1  ;;  %v609_v55 = vadd.f32 %v1339_v43, %v1675_v36  ;;  %v680_v57 = vmul.f32 %v1684_v47, %v641_v44 }
  0xfb   : > { %v524_v51 = vadd.f32 %v1675_v36, %v523_v42  ;;  %v663_v52 = vmul.f32 %v1684_v47, %v624_v38  ;;  %v627_v54 = vmax.f32 %v529_v45, 0.0  ;;  %v723_v56 = vsel %vm683_vm1, %v664_v48, 0.0 }
  0xfc   : > { %706 = vadd.xlane.f32.xlu1 %v705_v59  ;;  %v604_v60 = vadd.f32 %v1675_v36, %v603_v53  ;;  %v679_v61 = vmul.f32 %v1684_v47, %v640_v49  ;;  %v771_v63 = vsel %vm683_vm1, %v680_v57, 0.0  ;;  %v1779_v9 = vstv %s780_s24 }
  0xfd   : > { %703 = vadd.xlane.f32.xlu0 %v702_v62  ;;  %v626_v58 = vmax.f32 %v524_v51, 0.0  ;;  %v720_v59 = vsel %vm683_vm1, %v663_v52, 0.0  ;;  %v643_v62 = vmax.f32 %v609_v55, 0.0  ;;  %v666_v2 = vmul.f32 %v1684_v47, %v627_v54 }
  0xfe   : > { %v642_v0 = vmax.f32 %v604_v60, 0.0  ;;  %v768_v1 = vsel %vm683_vm1, %v679_v61, 0.0 }
  0xff   : > { %v665_v3 = vmul.f32 %v1684_v47, %v626_v58  ;;  %v729_v4 = vsel %vm683_vm1, %v666_v2, 0.0 }
 0x100   : > { %754 = vadd.xlane.f32.xlu1 %v753_v5  ;;  %v682_v5 = vmul.f32 %v1684_v47, %v643_v62  ;;  %v681_v6 = vmul.f32 %v1684_v47, %v642_v0 }
 0x101   : > { %751 = vadd.xlane.f32.xlu0 %v750_v8  ;;  %v726_v36 = vsel %vm683_vm1, %v665_v3, 0.0 }
 0x102   : > { %v777_v7 = vsel %vm683_vm1, %v682_v5, 0.0  ;;  %v774_v8 = vsel %vm683_vm1, %v681_v6, 0.0 }
 0x104   : > { %712 = vadd.xlane.f32.xlu1 %v711_v15 }
 0x105   : > { %709 = vadd.xlane.f32.xlu0 %v708_v18 }
 0x108   : > { %760 = vadd.xlane.f32.xlu1 %v759_v25 }
 0x109   : > { %757 = vadd.xlane.f32.xlu0 %v756_v28 }
 0x10c   : > { %718 = vadd.xlane.f32.xlu1 %v717_v35 }
 0x10d   : > { %715 = vadd.xlane.f32.xlu0 %v714_v39 }
 0x110   : > { %766 = vadd.xlane.f32.xlu1 %v765_v46 }
 0x111   : > { %763 = vadd.xlane.f32.xlu0 %v762_v50 }
 0x114   : > { %724 = vadd.xlane.f32.xlu1 %v723_v56 }
 0x115   : > { %721 = vadd.xlane.f32.xlu0 %v720_v59 }
 0x118   : > { %772 = vadd.xlane.f32.xlu1 %v771_v63 }
 0x119   : > { %769 = vadd.xlane.f32.xlu0 %v768_v1 }
 0x11c   : > { %730 = vadd.xlane.f32.xlu1 %v729_v4 }
 0x11d   : > { %727 = vadd.xlane.f32.xlu0 %v726_v36 }
 0x120   : > { %778 = vadd.xlane.f32.xlu1 %v777_v7 }
 0x121   : > { %775 = vadd.xlane.f32.xlu0 %v774_v8 }
 0x16d   : > { %v737_v10 = vpop.xlane.xlu1 %736 }
 0x16e   : > { %v689_v11 = vpop.xlane.xlu0 %688  ;;  %v799_v12 = vadd.f32 %v1779_v9, %v737_v10 }
 0x16f   : > { %v783_v47 = vadd.f32 %v1779_v9, %v689_v11 }
 0x170   : > { %832 = vst.msk [vmem:[%s1783_s29 + $0x88] sm:$0xff] %vm814_vm2, %v799_v12 }
 0x171   : > { %816 = vst.msk [vmem:[%s1783_s29 + $0x8] sm:$0xff] %vm814_vm2, %v783_v47  ;;  %v695_v13 = vpop.xlane.xlu1 %694 }
 0x172   : > { %v686_v14 = vpop.xlane.xlu0 %685  ;;  %v785_v15 = vadd.f32 %v1779_v9, %v695_v13 }
 0x173   : > { %v782_v16 = vadd.f32 %v1779_v9, %v686_v14 }
 0x174   : > { %818 = vst.msk [vmem:[%s1783_s29 + $0x18] sm:$0xff] %vm814_vm2, %v785_v15 }
 0x175   : > { %815 = vst.msk [vmem:[%s1783_s29] sm:$0xff] %vm814_vm2, %v782_v16  ;;  %v743_v17 = vpop.xlane.xlu1 %742 }
 0x176   : > { %v734_v18 = vpop.xlane.xlu0 %733  ;;  %v801_v19 = vadd.f32 %v1779_v9, %v743_v17 }
 0x177   : > { %v798_v20 = vadd.f32 %v1779_v9, %v734_v18 }
 0x178   : > { %834 = vst.msk [vmem:[%s1783_s29 + $0x98] sm:$0xff] %vm814_vm2, %v801_v19 }
 0x179   : > { %831 = vst.msk [vmem:[%s1783_s29 + $0x80] sm:$0xff] %vm814_vm2, %v798_v20  ;;  %v692_v21 = vpop.xlane.xlu1 %691 }
 0x17a   : > { %v740_v22 = vpop.xlane.xlu0 %739  ;;  %v784_v23 = vadd.f32 %v1779_v9, %v692_v21 }
 0x17b   : > { %v800_v24 = vadd.f32 %v1779_v9, %v740_v22 }
 0x17c   : > { %817 = vst.msk [vmem:[%s1783_s29 + $0x10] sm:$0xff] %vm814_vm2, %v784_v23 }
 0x17d   : > { %833 = vst.msk [vmem:[%s1783_s29 + $0x90] sm:$0xff] %vm814_vm2, %v800_v24  ;;  %v701_v25 = vpop.xlane.xlu1 %700 }
 0x17e   : > { %v698_v26 = vpop.xlane.xlu0 %697  ;;  %v787_v27 = vadd.f32 %v1779_v9, %v701_v25 }
 0x17f   : > { %v786_v28 = vadd.f32 %v1779_v9, %v698_v26 }
 0x180   : > { %820 = vst.msk [vmem:[%s1783_s29 + $0x28] sm:$0xff] %vm814_vm2, %v787_v27 }
 0x181   : > { %819 = vst.msk [vmem:[%s1783_s29 + $0x20] sm:$0xff] %vm814_vm2, %v786_v28  ;;  %v749_v29 = vpop.xlane.xlu1 %748 }
 0x182   : > { %v746_v30 = vpop.xlane.xlu0 %745  ;;  %v803_v31 = vadd.f32 %v1779_v9, %v749_v29 }
 0x183   : > { %v802_v32 = vadd.f32 %v1779_v9, %v746_v30 }
 0x184   : > { %836 = vst.msk [vmem:[%s1783_s29 + $0xa8] sm:$0xff] %vm814_vm2, %v803_v31 }
 0x185   : > { %835 = vst.msk [vmem:[%s1783_s29 + $0xa0] sm:$0xff] %vm814_vm2, %v802_v32  ;;  %v707_v33 = vpop.xlane.xlu1 %706 }
 0x186   : > { %v704_v34 = vpop.xlane.xlu0 %703  ;;  %v789_v35 = vadd.f32 %v1779_v9, %v707_v33 }
 0x187   : > { %v788_v37 = vadd.f32 %v1779_v9, %v704_v34 }
 0x188   : > { %822 = vst.msk [vmem:[%s1783_s29 + $0x38] sm:$0xff] %vm814_vm2, %v789_v35 }
 0x189   : > { %821 = vst.msk [vmem:[%s1783_s29 + $0x30] sm:$0xff] %vm814_vm2, %v788_v37  ;;  %v755_v38 = vpop.xlane.xlu1 %754 }
 0x18a   : > { %v752_v39 = vpop.xlane.xlu0 %751  ;;  %v805_v40 = vadd.f32 %v1779_v9, %v755_v38 }
 0x18b   : > { %v804_v41 = vadd.f32 %v1779_v9, %v752_v39 }
 0x18c   : > { %838 = vst.msk [vmem:[%s1783_s29 + $0xb8] sm:$0xff] %vm814_vm2, %v805_v40 }
 0x18d   : > { %837 = vst.msk [vmem:[%s1783_s29 + $0xb0] sm:$0xff] %vm814_vm2, %v804_v41  ;;  %v713_v42 = vpop.xlane.xlu1 %712 }
 0x18e   : > { %v710_v43 = vpop.xlane.xlu0 %709  ;;  %v791_v44 = vadd.f32 %v1779_v9, %v713_v42 }
 0x18f   : > { %v790_v45 = vadd.f32 %v1779_v9, %v710_v43 }
 0x190   : > { %824 = vst.msk [vmem:[%s1783_s29 + $0x48] sm:$0xff] %vm814_vm2, %v791_v44 }
 0x191   : > { %823 = vst.msk [vmem:[%s1783_s29 + $0x40] sm:$0xff] %vm814_vm2, %v790_v45  ;;  %v761_v46 = vpop.xlane.xlu1 %760 }
 0x192   : > { %v758_v48 = vpop.xlane.xlu0 %757  ;;  %v807_v49 = vadd.f32 %v1779_v9, %v761_v46 }
 0x193   : > { %v806_v50 = vadd.f32 %v1779_v9, %v758_v48 }
 0x194   : > { %840 = vst.msk [vmem:[%s1783_s29 + $0xc8] sm:$0xff] %vm814_vm2, %v807_v49 }
 0x195   : > { %839 = vst.msk [vmem:[%s1783_s29 + $0xc0] sm:$0xff] %vm814_vm2, %v806_v50  ;;  %v719_v51 = vpop.xlane.xlu1 %718 }
 0x196   : > { %v716_v52 = vpop.xlane.xlu0 %715  ;;  %v793_v53 = vadd.f32 %v1779_v9, %v719_v51 }
 0x197   : > { %v792_v54 = vadd.f32 %v1779_v9, %v716_v52 }
 0x198   : > { %826 = vst.msk [vmem:[%s1783_s29 + $0x58] sm:$0xff] %vm814_vm2, %v793_v53 }
 0x199   : > { %825 = vst.msk [vmem:[%s1783_s29 + $0x50] sm:$0xff] %vm814_vm2, %v792_v54  ;;  %v767_v55 = vpop.xlane.xlu1 %766 }
 0x19a   : > { %v764_v56 = vpop.xlane.xlu0 %763  ;;  %v809_v57 = vadd.f32 %v1779_v9, %v767_v55 }
 0x19b   : > { %v808_v58 = vadd.f32 %v1779_v9, %v764_v56 }
 0x19c   : > { %842 = vst.msk [vmem:[%s1783_s29 + $0xd8] sm:$0xff] %vm814_vm2, %v809_v57 }
 0x19d   : > { %841 = vst.msk [vmem:[%s1783_s29 + $0xd0] sm:$0xff] %vm814_vm2, %v808_v58  ;;  %v725_v59 = vpop.xlane.xlu1 %724 }
 0x19e   : > { %v722_v60 = vpop.xlane.xlu0 %721  ;;  %v795_v61 = vadd.f32 %v1779_v9, %v725_v59 }
 0x19f   : > { %v794_v62 = vadd.f32 %v1779_v9, %v722_v60 }
 0x1a0   : > { %828 = vst.msk [vmem:[%s1783_s29 + $0x68] sm:$0xff] %vm814_vm2, %v795_v61 }
 0x1a1   : > { %827 = vst.msk [vmem:[%s1783_s29 + $0x60] sm:$0xff] %vm814_vm2, %v794_v62  ;;  %v773_v63 = vpop.xlane.xlu1 %772 }
 0x1a2   : > { %v770_v0 = vpop.xlane.xlu0 %769  ;;  %v811_v1 = vadd.f32 %v1779_v9, %v773_v63 }
 0x1a3   : > { %v810_v2 = vadd.f32 %v1779_v9, %v770_v0 }
 0x1a4   : > { %844 = vst.msk [vmem:[%s1783_s29 + $0xe8] sm:$0xff] %vm814_vm2, %v811_v1 }
 0x1a5   : > { %843 = vst.msk [vmem:[%s1783_s29 + $0xe0] sm:$0xff] %vm814_vm2, %v810_v2  ;;  %v731_v3 = vpop.xlane.xlu1 %730 }
 0x1a6   : > { %v728_v4 = vpop.xlane.xlu0 %727  ;;  %v797_v36 = vadd.f32 %v1779_v9, %v731_v3 }
 0x1a7   : > { %v796_v5 = vadd.f32 %v1779_v9, %v728_v4 }
 0x1a8   : > { %830 = vst.msk [vmem:[%s1783_s29 + $0x78] sm:$0xff] %vm814_vm2, %v797_v36 }
 0x1a9   : > { %829 = vst.msk [vmem:[%s1783_s29 + $0x70] sm:$0xff] %vm814_vm2, %v796_v5  ;;  %v779_v6 = vpop.xlane.xlu1 %778  ;;  %853 = sbr.rel (!%p1582_p4) target bundleno = 478 (0x1de), region = 44 }
 0x1aa   : > { %v776_v7 = vpop.xlane.xlu0 %775  ;;  %v813_v8 = vadd.f32 %v1779_v9, %v779_v6 }
 0x1ab   : > { %v812_v10 = vadd.f32 %v1779_v9, %v776_v7 }
 0x1ac   : > { %846 = vst.msk [vmem:[%s1783_s29 + $0xf8] sm:$0xff] %vm814_vm2, %v813_v8 }
 0x1ad   : > { %845 = vst.msk [vmem:[%s1783_s29 + $0xf0] sm:$0xff] %vm814_vm2, %v812_v10 }
 0x1ae   : > { %s2034_s20 = smov (!%p856_p8, %s855_s20), 32 }
 0x1af   : > { %s1230_s10 = sshll.u32 %s2034_s20, 7 }
 0x1b0   : > { %p1233_p9 = scmp.eq.s32.totalorder %s1230_s10, 0 }
 0x1b1   : > { %s1892_s11 = sshrl.u32 (!%p1233_p9), %s2034_s20, 5 }
 0x1b2   : > { %864 = sbr.rel (%p1233_p9) target bundleno = 478 (0x1de), region = 48  ;;  %p1234_p10 = scmp.le.s32.totalorder (!%p1233_p9), %s1892_s11, 0 }
 0x1b7   : > { %1143 = sbr.rel (%p1234_p10) target bundleno = 461 (0x1cd), region = 124  ;;  %s2025_s4 = smov (!%p1234_p10), %s1886_s9 }
 0x1b8   : > { %s2026_s27 = smov (!%p1234_p10), %s1783_s29  ;;  %s1901_s7 = smov (!%p1234_p10), 0  }
 0x1b9   : > { %s1903_s12 = smov (!%p1234_p10), 0  }
 0x1bc LB: >> { %v989_v9 = vld [vmem:[%s1498_s27] sm:$0xff]  ;;  %v991_v11 = vld [vmem:[%s1498_s27 + $0x8] sm:$0xff]  ;;  %v993_v12 = vld [vmem:[%s1498_s27 + $0x10] sm:$0xff]  ;;  %s1053_s13 = sadd.s32 1, %s1502_s7  ;;  %s983_s12 = sadd.s32 1, %s1506_s12   ;;  %s1506_s12 = sphi %s1903_s12, %s983_s12   ;;  %s1502_s7 = sphi %s1901_s7, %s2029_s7   ;;  %s1498_s27 = sphi %s2026_s27, %s2028_s27   ;;  %s1494_s4 = sphi %s2025_s4, %s2027_s4  }
 0x1bd   : >> { %990 = vst [vmem:[%s1494_s4] sm:$0xff] %v989_v9  ;;  %992 = vst [vmem:[%s1494_s4 + $0x8] sm:$0xff] %v991_v11  ;;  %v995_v47 = vld [vmem:[%s1498_s27 + $0x18] sm:$0xff]  ;;  %v997_v13 = vld [vmem:[%s1498_s27 + $0x20] sm:$0xff]  ;;  %p1054_p11 = scmp.ge.s32.totalorder %s1053_s13, %s1892_s11  ;;  %p982_p12 = scmp.ge.s32.totalorder %s983_s12, %s1892_s11 }
 0x1be   : >> { %994 = vst [vmem:[%s1494_s4 + $0x10] sm:$0xff] %v993_v12  ;;  %v999_v14 = vld [vmem:[%s1498_s27 + $0x28] sm:$0xff]  ;;  %996 = vst [vmem:[%s1494_s4 + $0x18] sm:$0xff] %v995_v47  ;;  %v1001_v15 = vld [vmem:[%s1498_s27 + $0x30] sm:$0xff] }
 0x1bf   : >> { %998 = vst [vmem:[%s1494_s4 + $0x20] sm:$0xff] %v997_v13  ;;  %1000 = vst [vmem:[%s1494_s4 + $0x28] sm:$0xff] %v999_v14  ;;  %v1003_v16 = vld [vmem:[%s1498_s27 + $0x38] sm:$0xff]  ;;  %v1005_v17 = vld [vmem:[%s1498_s27 + $0x40] sm:$0xff]  ;;  %s2036_s13 = smov (%p1054_p11, %s1053_s13), 0 }
 0x1c0   : >> { %1002 = vst [vmem:[%s1494_s4 + $0x30] sm:$0xff] %v1001_v15  ;;  %1004 = vst [vmem:[%s1494_s4 + $0x38] sm:$0xff] %v1003_v16  ;;  %v1007_v18 = vld [vmem:[%s1498_s27 + $0x48] sm:$0xff]  ;;  %v1009_v19 = vld [vmem:[%s1498_s27 + $0x50] sm:$0xff]  ;;  %s1235_s14 = sshll.u32 %s2036_s13, 8  ;;  %s2029_s7 = smov %s2036_s13 }
 0x1c1   : >> { %1006 = vst [vmem:[%s1494_s4 + $0x40] sm:$0xff] %v1005_v17  ;;  %v1011_v20 = vld [vmem:[%s1498_s27 + $0x58] sm:$0xff]  ;;  %1008 = vst [vmem:[%s1494_s4 + $0x48] sm:$0xff] %v1007_v18  ;;  %v1013_v21 = vld [vmem:[%s1498_s27 + $0x60] sm:$0xff]  ;;  %s1959_s15 = scalar_lea.vmem %s1783_s29, %s1235_s14 [#allocation3]   ;;  %s1059_s16 = scalar_lea.vmem %s1886_s9, %s1235_s14  }
 0x1c2   : >> { %1010 = vst [vmem:[%s1494_s4 + $0x50] sm:$0xff] %v1009_v19  ;;  %1012 = vst [vmem:[%s1494_s4 + $0x58] sm:$0xff] %v1011_v20  ;;  %v1015_v22 = vld [vmem:[%s1498_s27 + $0x68] sm:$0xff]  ;;  %v1017_v23 = vld [vmem:[%s1498_s27 + $0x70] sm:$0xff] }
 0x1c3   : >> { %1014 = vst [vmem:[%s1494_s4 + $0x60] sm:$0xff] %v1013_v21  ;;  %1016 = vst [vmem:[%s1494_s4 + $0x68] sm:$0xff] %v1015_v22  ;;  %v1019_v24 = vld [vmem:[%s1498_s27 + $0x78] sm:$0xff]  ;;  %v1021_v25 = vld [vmem:[%s1498_s27 + $0x80] sm:$0xff] }
 0x1c4   : >> { %1018 = vst [vmem:[%s1494_s4 + $0x70] sm:$0xff] %v1017_v23  ;;  %v1023_v26 = vld [vmem:[%s1498_s27 + $0x88] sm:$0xff]  ;;  %1020 = vst [vmem:[%s1494_s4 + $0x78] sm:$0xff] %v1019_v24  ;;  %v1025_v27 = vld [vmem:[%s1498_s27 + $0x90] sm:$0xff] }
 0x1c5   : >> { %1022 = vst [vmem:[%s1494_s4 + $0x80] sm:$0xff] %v1021_v25  ;;  %1024 = vst [vmem:[%s1494_s4 + $0x88] sm:$0xff] %v1023_v26  ;;  %v1027_v28 = vld [vmem:[%s1498_s27 + $0x98] sm:$0xff]  ;;  %v1029_v29 = vld [vmem:[%s1498_s27 + $0xa0] sm:$0xff] }
 0x1c6   : >> { %1026 = vst [vmem:[%s1494_s4 + $0x90] sm:$0xff] %v1025_v27  ;;  %1028 = vst [vmem:[%s1494_s4 + $0x98] sm:$0xff] %v1027_v28  ;;  %v1031_v30 = vld [vmem:[%s1498_s27 + $0xa8] sm:$0xff]  ;;  %v1033_v31 = vld [vmem:[%s1498_s27 + $0xb0] sm:$0xff] }
 0x1c7   : >> { %1030 = vst [vmem:[%s1494_s4 + $0xa0] sm:$0xff] %v1029_v29  ;;  %v1035_v32 = vld [vmem:[%s1498_s27 + $0xb8] sm:$0xff]  ;;  %1032 = vst [vmem:[%s1494_s4 + $0xa8] sm:$0xff] %v1031_v30  ;;  %v1037_v33 = vld [vmem:[%s1498_s27 + $0xc0] sm:$0xff] }
 0x1c8   : >> { %1034 = vst [vmem:[%s1494_s4 + $0xb0] sm:$0xff] %v1033_v31  ;;  %1036 = vst [vmem:[%s1494_s4 + $0xb8] sm:$0xff] %v1035_v32  ;;  %v1039_v34 = vld [vmem:[%s1498_s27 + $0xc8] sm:$0xff]  ;;  %v1041_v35 = vld [vmem:[%s1498_s27 + $0xd0] sm:$0xff]  ;;  %985 = sbr.rel (!%p982_p12) target bundleno = 444 (0x1bc), region = 130 }
 0x1c9   : >> { %1038 = vst [vmem:[%s1494_s4 + $0xc0] sm:$0xff] %v1037_v33  ;;  %1040 = vst [vmem:[%s1494_s4 + $0xc8] sm:$0xff] %v1039_v34  ;;  %v1043_v37 = vld [vmem:[%s1498_s27 + $0xd8] sm:$0xff]  ;;  %v1045_v38 = vld [vmem:[%s1498_s27 + $0xe0] sm:$0xff] }
 0x1ca   : >> { %1042 = vst [vmem:[%s1494_s4 + $0xd0] sm:$0xff] %v1041_v35  ;;  %v1047_v39 = vld [vmem:[%s1498_s27 + $0xe8] sm:$0xff]  ;;  %1044 = vst [vmem:[%s1494_s4 + $0xd8] sm:$0xff] %v1043_v37  ;;  %v1049_v40 = vld [vmem:[%s1498_s27 + $0xf0] sm:$0xff] }
 0x1cb   : >> { %1046 = vst [vmem:[%s1494_s4 + $0xe0] sm:$0xff] %v1045_v38  ;;  %1048 = vst [vmem:[%s1494_s4 + $0xe8] sm:$0xff] %v1047_v39  ;;  %v1051_v41 = vld [vmem:[%s1498_s27 + $0xf8] sm:$0xff]  ;;  %s2028_s27 = smov %s1959_s15 }
 0x1cc   : >> { %1050 = vst [vmem:[%s1494_s4 + $0xf0] sm:$0xff] %v1049_v40  ;;  %1052 = vst [vmem:[%s1494_s4 + $0xf8] sm:$0xff] %v1051_v41  ;;  %s2027_s4 = smov %s1059_s16 }
 0x1cd PF: > { %s2000_s17 = sand.u32 31, %s2034_s20   ;;  %s1246_s18 = sshll.u32 %s1892_s11, 8 }
 0x1ce   : > { %s1064_s19 = scalar_lea.vmem %s1783_s29, %s1246_s18 [#allocation3]   ;;  %s1066_s22 = scalar_lea.vmem %s1886_s9, %s1246_s18  }
 0x1cf   : > { %p1240_p13 = scmp.le.s32.totalorder %s2000_s17, 0 }
 0x1d0   : > { %s1508_s24 = smov (!%p1240_p13), %s1066_s22   ;;  %s1512_s25 = smov (!%p1240_p13), %s1064_s19  }
 0x1d1   : > { %1157 = sbr.rel (%p1240_p13) target bundleno = 478 (0x1de), region = 135  ;;  %s1516_s28 = smov (!%p1240_p13), 0  }
 0x1d2   : > { %s1520_s30 = smov (!%p1240_p13), 0  }
 0x1d6 LB: >> { %v1076_v42 = vld [vmem:[%s1514_s25] sm:$0xff]  ;;  %s1078_s20 = sadd.s32 1, %s1518_s28  ;;  %s1070_s30 = sadd.s32 1, %s1522_s30   ;;  %s1522_s30 = sphi %s1520_s30, %s1070_s30   ;;  %s1518_s28 = sphi %s1516_s28, %s1517_s28   ;;  %s1514_s25 = sphi %s1512_s25, %s1083_s25   ;;  %s1510_s24 = sphi %s1508_s24, %s1084_s24  }
 0x1d7   : >> { %1077 = vst [vmem:[%s1510_s24] sm:$0xff] %v1076_v42  ;;  %p1079_p0 = scmp.ge.s32.totalorder %s1078_s20, %s2000_s17  ;;  %p1069_p1 = scmp.ge.s32.totalorder %s1070_s30, %s2000_s17 }
 0x1d9   : >> { %s2038_s20 = smov (%p1079_p0, %s1078_s20), 0  ;;  %1072 = sbr.rel (!%p1069_p1) target bundleno = 470 (0x1d6), region = 141 }
 0x1da   : >> { %s1241_s29 = sshll.u32 %s2038_s20, 3  ;;  %s1517_s28 = smov %s2038_s20  }
 0x1db   : >> { %s1083_s25 = scalar_lea.vmem %s1064_s19, %s1241_s29 [#allocation3]   ;;  %s1084_s24 = scalar_lea.vmem %s1066_s22, %s1241_s29  }
 0x1de PF: > { %p13_p2 = scmp.ge.s32.totalorder %s1572_s23, 4   ;;  %s2030_s20 = smov %s1486_s21 }
 0x1df   : > { %s2031_s21 = smov %s1580_s26  ;;  %s2032_s22 = smov %s1572_s23 }
 0x1e0   :  { %15 = sbr.rel (!%p13_p2) target bundleno = 4 (0x4), region = 152 }

</bundles_post_ra>
